<compile_context>
chip_gen: v5e
topology: v5e:2x2
jax: 0.10.0
libtpu: 0.0.40
codegen_flags: <defaults>
</compile_context>

<pallas_src>
import jax
import jax.numpy as jnp
from jax.experimental import pallas as pl
from jax.experimental.pallas import tpu as pltpu


_MASK = -1e30    # masked-out logit
_INIT_M = -1e18  # running-max init: masked entries underflow exp() to exactly 0


def _round_up(v, m):
    return (v + m - 1) // m * m


def _pad_to(a, shape):
    return jnp.pad(a, [(0, t - s) for s, t in zip(a.shape, shape)])


def _wx_kernel(x_ref, w_ref, wx_ref):
    """wx[n_tile] = x[n_tile] @ [W_self | W_0 | ... | W_{R-1}] (bf16 in/out,
    f32 MXU accumulation)."""
    wx_ref[...] = jnp.dot(
        x_ref[...], w_ref[...],
        preferred_element_type=jnp.float32).astype(jnp.bfloat16)


def _rgat_attn_kernel(cnt_ref, sl_ref, self_ref, b_ref, asrc_ref, adst_ref,
                      wxs_ref, adj_ref, out_ref, m_sc, l_sc, acc_sc):
    d = pl.program_id(0)
    r = pl.program_id(1)
    s = pl.program_id(2)
    # number of non-empty src tiles for this (dst tile, relation)
    count = cnt_ref[d * pl.num_programs(1) + r]

    # First step of this dst tile: init resident output with the self-loop
    # Linear plus all folded biases (kept in f32).
    @pl.when((r == 0) & (s == 0))
    def _():
        out_ref[...] = self_ref[...].astype(jnp.float32) + b_ref[...]

    # New relation for this dst tile: reset the online-softmax state.
    @pl.when(s == 0)
    def _():
        m_sc[...] = jnp.full_like(m_sc, _INIT_M)
        l_sc[...] = jnp.zeros_like(l_sc)
        acc_sc[...] = jnp.zeros_like(acc_sc)

    # Only non-empty (d, r, s) tiles do work; the index_maps repeat the last
    # non-empty block index for s >= count so their DMA is also elided.
    @pl.when(s < count)
    def _():
        # Logits & softmax state stay f32 (mask relies on f32 exp underflow).
        logits = adst_ref[0] + asrc_ref[0]                   # (TD,1)+(1,TS)
        logits = jnp.maximum(logits, 0.2 * logits)           # leaky_relu(0.2)
        logits = jnp.where(adj_ref[0] > 0, logits, jnp.float32(_MASK))

        m_prev = m_sc[...]
        m_new = jnp.maximum(m_prev, jnp.max(logits, axis=-1, keepdims=True))
        alpha = jnp.exp(m_prev - m_new)
        p = jnp.exp(logits - m_new)             # masked entries underflow to 0
        l_sc[...] = alpha * l_sc[...] + jnp.sum(p, axis=-1, keepdims=True)
        acc_sc[...] = alpha * acc_sc[...] + jnp.dot(
            p.astype(jnp.bfloat16), wxs_ref[...],
            preferred_element_type=jnp.float32)
        m_sc[...] = m_new

    # Last non-empty src tile of this relation: normalize after the matmul
    # (EUP reciprocal) and fold into the resident accumulator.
    @pl.when(s == count - 1)
    def _():
        out_ref[...] += acc_sc[...] * pl.reciprocal(l_sc[...], approx=True)


def rgat_conv(x, edge_index, edge_type, params, num_relations, *,
              tile_d=256, tile_s=256, tile_stage1=512):
    """RGATConv forward (heads=1, negative_slope=0.2, add_self_loops=True)."""
    N, Fin = x.shape
    Fout = params["w_self"].shape[1]
    R = num_relations
    G = R + 1
    LANE = 128

    Fp = _round_up(Fout, LANE)
    Fin_p = _round_up(Fin, LANE)
    N_pad = _round_up(N, LANE)

    def _fit(t):
        t = max(LANE, min(t, N_pad))
        t = (t // LANE) * LANE
        while N_pad % t:
            t -= LANE
        return t

    tile_d = _fit(tile_d)
    tile_s = _fit(tile_s)
    tile_1 = _fit(tile_stage1)
    # v7x has 2 TensorCores; the "parallel" dst axis is the only thing sharded
    # across them, so keep >= 2 dst tiles when possible.
    while N_pad // tile_d < 2 and tile_d > LANE:
        tile_d //= 2
    num_d = N_pad // tile_d
    num_s = N_pad // tile_s
    num_1 = N_pad // tile_1

    # ---- parameter / input prep (lane-dense padded, bf16 matmul operands) ---
    x_f32 = x.astype(jnp.float32)
    x_p = _pad_to(x_f32, (N_pad, Fin_p)).astype(jnp.bfloat16)

    w_self_p = _pad_to(params["w_self"], (Fin_p, Fp))
    W_p = _pad_to(params["W"], (R, Fin_p, Fp))
    W_all = jnp.concatenate([w_self_p[None], W_p], axis=0)          # (G,Fin_p,Fp)
    W_cat = jnp.transpose(W_all, (1, 0, 2)).reshape(Fin_p, G * Fp)  # wide weight
    W_cat = W_cat.astype(jnp.bfloat16)

    # self-loop bias + every relation's GAT bias, applied once at init (f32)
    b_total = _pad_to(params["b_self"] + jnp.sum(params["bias"], axis=0),
                      (1, Fp)).astype(jnp.float32)

    # Per-node, per-relation attention halves, precomputed as tiny matmuls:
    #   a_src[r, j] = (x @ W[r]) @ att_src[r] == x @ (W[r] @ att_src[r])
    asw = jnp.einsum("rio,ro->ri", params["W"], params["att_src"][:, 0])  # (R,Fin)
    adw = jnp.einsum("rio,ro->ri", params["W"], params["att_dst"][:, 0])  # (R,Fin)
    a_src = jnp.einsum("ni,ri->rn", x_f32, asw)                           # (R,N)
    a_dst = jnp.einsum("ni,ri->rn", x_f32, adw)                           # (R,N)
    a_src_p = _pad_to(a_src, (R, N_pad)).reshape(R, 1, N_pad)
    a_dst_p = _pad_to(a_dst, (R, N_pad)).reshape(R, N_pad, 1)

    # Dense int8 adjacency adj[r, dst, src], plus self-loops on every (padded)
    # node (GATConv add_self_loops=True).  TODO(synk): block-sparse for big N.
    adj = jnp.zeros((R, N_pad, N_pad), jnp.int8)
    adj = adj.at[edge_type, edge_index[1], edge_index[0]].set(1)
    diag = jnp.arange(N_pad)
    adj = adj.at[:, diag, diag].set(1)

    # Per-(dst tile, relation) occupancy: counts + ordered lists of non-empty
    # src tiles (padded by repeating the last valid entry -> DMA is skipped).
    occ = jnp.any(adj.reshape(R, num_d, tile_d, num_s, tile_s) != 0,
                  axis=(2, 4))                                        # (R,nd,ns)
    counts = jnp.sum(occ, axis=-1).astype(jnp.int32)                  # (R,nd)
    order = jnp.argsort(jnp.where(occ, 0, 1), axis=-1, stable=True)   # non-empty first
    pos = jnp.minimum(jnp.arange(num_s, dtype=jnp.int32)[None, None, :],
                      jnp.maximum(counts[..., None] - 1, 0))
    s_list = jnp.take_along_axis(order, pos, axis=-1).astype(jnp.int32)
    counts_flat = jnp.transpose(counts, (1, 0)).reshape(-1)           # idx d*R+r
    s_list_flat = jnp.transpose(s_list, (1, 0, 2)).reshape(-1)        # (d*R+r)*ns+s

    # ---- Stage 1: wx = x @ [W_self | W_0 | ... | W_{R-1}]  (bf16 out) -------
    wx_all = pl.pallas_call(
        _wx_kernel,
        out_shape=jax.ShapeDtypeStruct((N_pad, G * Fp), jnp.bfloat16),
        grid_spec=pltpu.PrefetchScalarGridSpec(
            num_scalar_prefetch=0,
            grid=(num_1,),
            in_specs=[
                pl.BlockSpec((tile_1, Fin_p), lambda n: (n, 0)),
                pl.BlockSpec((Fin_p, G * Fp), lambda n: (0, 0)),   # resident W
            ],
            out_specs=pl.BlockSpec((tile_1, G * Fp), lambda n: (n, 0)),
        ),
        compiler_params=pltpu.CompilerParams(
            dimension_semantics=("parallel",),
            vmem_limit_bytes=32 * 1024 * 1024),
        cost_estimate=pl.CostEstimate(
            flops=2 * N_pad * Fin_p * G * Fp,
            transcendentals=0,
            bytes_accessed=2 * (N_pad * Fin_p + Fin_p * G * Fp
                                + N_pad * G * Fp)),
    )(x_p, W_cat)

    # ---- Stage 2: tiled flash-style relational attention --------------------
    def _s_act(d, r, s, cnt, sl):
        return sl[(d * R + r) * num_s + s]

    out_pad = pl.pallas_call(
        _rgat_attn_kernel,
        out_shape=jax.ShapeDtypeStruct((N_pad, Fp), jnp.float32),
        grid_spec=pltpu.PrefetchScalarGridSpec(
            num_scalar_prefetch=2,                      # counts, s_list
            grid=(num_d, R, num_s),
            in_specs=[
                # self-loop init: wx column-group 0, dst tile (bf16)
                pl.BlockSpec((tile_d, Fp), lambda d, r, s, cnt, sl: (d, 0)),
                # folded biases (f32)
                pl.BlockSpec((1, Fp), lambda d, r, s, cnt, sl: (0, 0)),
                # a_src row for (relation, src tile)
                pl.BlockSpec((1, 1, tile_s),
                             lambda d, r, s, cnt, sl: (r, 0, _s_act(d, r, s, cnt, sl))),
                # a_dst column for (relation, dst tile)
                pl.BlockSpec((1, tile_d, 1), lambda d, r, s, cnt, sl: (r, d, 0)),
                # wx of the src tile for relation r (bf16, column-group r+1)
                pl.BlockSpec((tile_s, Fp),
                             lambda d, r, s, cnt, sl: (_s_act(d, r, s, cnt, sl), r + 1)),
                # int8 adjacency tile
                pl.BlockSpec((1, tile_d, tile_s),
                             lambda d, r, s, cnt, sl: (r, d, _s_act(d, r, s, cnt, sl))),
            ],
            out_specs=pl.BlockSpec((tile_d, Fp), lambda d, r, s, cnt, sl: (d, 0)),
            scratch_shapes=[
                pltpu.VMEM((tile_d, 1), jnp.float32),    # running max
                pltpu.VMEM((tile_d, 1), jnp.float32),    # running denom
                pltpu.VMEM((tile_d, Fp), jnp.float32),   # unnormalized acc
            ],
        ),
        compiler_params=pltpu.CompilerParams(
            dimension_semantics=("parallel", "arbitrary", "arbitrary"),
            vmem_limit_bytes=32 * 1024 * 1024),
        cost_estimate=pl.CostEstimate(
            flops=2 * R * N_pad * N_pad * Fp + 10 * R * N_pad * N_pad,
            transcendentals=R * N_pad * N_pad,
            bytes_accessed=(R * N_pad * N_pad                 # int8 adjacency
                            + 2 * num_d * R * N_pad * Fp      # wx_src re-reads (bf16)
                            + 2 * N_pad * Fp                  # self-loop wx (bf16)
                            + 4 * N_pad * Fp                  # f32 output
                            + 4 * 2 * R * N_pad)),            # a_src / a_dst
    )(counts_flat, s_list_flat, wx_all, b_total, a_src_p, a_dst_p, wx_all, adj)

    return out_pad[:N, :Fout]


def rgat_ref(x, edge_index, edge_type, params, num_relations):
    """Pure-JAX f32 reference (same dense-adjacency semantics)."""
    N = x.shape[0]
    R = num_relations
    adj = jnp.zeros((R, N, N), jnp.float32)
    adj = adj.at[edge_type, edge_index[1], edge_index[0]].set(1.0)
    adj = jnp.maximum(adj, jnp.eye(N, dtype=jnp.float32)[None])

    out = x @ params["w_self"] + params["b_self"]
    for r in range(R):
        wx = x @ params["W"][r]
        a_src = wx @ params["att_src"][r, 0]
        a_dst = wx @ params["att_dst"][r, 0]
        logits = a_dst[:, None] + a_src[None, :]
        logits = jnp.where(logits >= 0.0, logits, 0.2 * logits)
        mask = adj[r] > 0.0
        logits = jnp.where(mask, logits, -1e30)
        m = jnp.max(logits, axis=-1, keepdims=True)
        p = jnp.where(mask, jnp.exp(logits - m), 0.0)
        attn = p / jnp.sum(p, axis=-1, keepdims=True)
        out = out + attn @ wx + params["bias"][r]
    return out


if __name__ == "__main__":
    # 256 nodes with tile_d = tile_s = 128 -> 2x2 (dst, src) tiles: exercises
    # the multi-tile online softmax, >=2 "parallel" dst tiles (dual-TC), and —
    # because destinations are restricted to the first half of the nodes —
    # the scalar-prefetch sparsity skip (dst tile 1 only sees its self-loops).
    N, F_IN, F_OUT, R, E = 256, 64, 64, 3, 512

    key = jax.random.PRNGKey(0)
    ks = jax.random.split(key, 10)

    x = jax.random.normal(ks[0], (N, F_IN), jnp.float32)
    edge_src = jax.random.randint(ks[1], (E,), 0, N)
    edge_dst = jax.random.randint(ks[2], (E,), 0, N // 2)
    edge_index = jnp.stack([edge_src, edge_dst], axis=0)         # [2, E]
    edge_type = jax.random.randint(ks[3], (E,), 0, R)

    scale = 0.1
    params = {
        # self-loop Linear (stored as [in, out]; torch stores [out, in])
        "w_self": scale * jax.random.normal(ks[4], (F_IN, F_OUT), jnp.float32),
        "b_self": scale * jax.random.normal(ks[5], (1, F_OUT), jnp.float32),
        # per-relation GATConv params (heads=1)
        "W": scale * jax.random.normal(ks[6], (R, F_IN, F_OUT), jnp.float32),
        "att_src": scale * jax.random.normal(ks[7], (R, 1, F_OUT), jnp.float32),
        "att_dst": scale * jax.random.normal(ks[8], (R, 1, F_OUT), jnp.float32),
        "bias": scale * jax.random.normal(ks[9], (R, 1, F_OUT), jnp.float32),
    }

    out = jax.block_until_ready(
        rgat_conv(x, edge_index, edge_type, params, R,
                  tile_d=128, tile_s=128, tile_stage1=256))
    ref = rgat_ref(x, edge_index, edge_type, params, R)

    assert out.shape == (N, F_OUT)
    # bf16 wx / bf16 p@wx / approximate EUP reciprocal loosen the tolerance a
    # bit vs the pure-f32 reference.
    assert jnp.allclose(out, ref, atol=3e-2, rtol=3e-2), "mismatch vs reference"

    print("KERNEL_OK")
</pallas_src>

<mosaic_0001>
module attributes {stable_mosaic.version = 11 : i64} {
  func.func @_wx_kernel(%arg0: i32, %arg1: memref<256x128xbf16, #tpu.memory_space<vmem>>, %arg2: memref<128x512xbf16, #tpu.memory_space<vmem>>, %arg3: memref<256x512xbf16, #tpu.memory_space<vmem>>) attributes {dimension_semantics = [#tpu.dimension_semantics<parallel>], iteration_bounds = array<i64: 1>, scalar_prefetch = 0 : i64, scratch_operands = 0 : i64, tpu.core_type = #tpu.core_type<tc>, window_params = [{transform_indices = @transform_0, window_bounds = array<i64: 256, 128>}, {pipeline_mode = #tpu.pipeline_mode<synchronous>, transform_indices = @transform_1, window_bounds = array<i64: 128, 512>}, {transform_indices = @transform_2, window_bounds = array<i64: 256, 512>}]} {
    %c0 = arith.constant 0 : index
    %c0_0 = arith.constant 0 : index
    %0 = vector.load %arg1[%c0, %c0_0] : memref<256x128xbf16, #tpu.memory_space<vmem>>, vector<256x128xbf16>
    %c0_1 = arith.constant 0 : index
    %c0_2 = arith.constant 0 : index
    %1 = vector.load %arg2[%c0_1, %c0_2] : memref<128x512xbf16, #tpu.memory_space<vmem>>, vector<128x512xbf16>
    %cst = arith.constant dense<0.000000e+00> : vector<256x512xf32>
    %2 = tpu.matmul %0, %1, %cst {dimension_numbers = #tpu.dot_dimension_numbers<[1], [0], [0], [1], [0, 0, 1, 1], [], []>} : vector<256x128xbf16>, vector<128x512xbf16>, vector<256x512xf32> -> vector<256x512xf32>
    %3 = arith.truncf %2 : vector<256x512xf32> to vector<256x512xbf16>
    %c0_3 = arith.constant 0 : index
    %c0_4 = arith.constant 0 : index
    %4 = vector.load %arg3[%c0_3, %c0_4] : memref<256x512xbf16, #tpu.memory_space<vmem>>, vector<256x512xbf16>
    tpu.vector_store %arg3[%c0_3, %c0_4], %3 {strides = array<i32>} : memref<256x512xbf16, #tpu.memory_space<vmem>>, vector<256x512xbf16>,
    return
  }
  func.func @transform_0(%arg0: i32) -> (i32, i32) {
    %c0_i32 = arith.constant 0 : i32
    %c0_i32_0 = arith.constant 0 : i32
    return %arg0, %c0_i32 : i32, i32
  }
  func.func @transform_1(%arg0: i32) -> (i32, i32) {
    %c0_i32 = arith.constant 0 : i32
    %c0_i32_0 = arith.constant 0 : i32
    %c0_i32_1 = arith.constant 0 : i32
    return %c0_i32, %c0_i32_0 : i32, i32
  }
  func.func @transform_2(%arg0: i32) -> (i32, i32) {
    %c0_i32 = arith.constant 0 : i32
    %c0_i32_0 = arith.constant 0 : i32
    return %arg0, %c0_i32 : i32, i32
  }
}

</mosaic_0001>

<bundles_post_ra>
// kernel: tpu_custom_call.1
= control target key start
LH: loop header
LB: loop body
LE: loop exit
PB: predicated region body
PF: predicated region fallthrough
CT: control target
= control target key end

     0   :  { %7 = vsyncpa [#allocation3], 0  ;;  %s1230_s0 = inlined_call_operand.hbm [shape: bf16[256,128], index: 0, kind: input, shape index: {}]   ;;  %s1231_s1 = inlined_call_operand.hbm [shape: bf16[128,512], index: 1, kind: input, shape index: {}]   ;;  %s1232_s2 = inlined_call_operand.hbm [shape: bf16[256,512], index: 2, kind: output, shape index: {}]  }
   0x1   :  { %8 = vsyncpa [#allocation6], 0 }
   0x2   :  { %9 = vsyncpa [#allocation4], 0  ;;  %s14_s11 = sshll.u32 %s1230_s0, 4  ;;  %s1193_s12 = smov [#allocation2]   ;;  %s15_s11 = int_to_ptr.hbm [resolvable:$true] %s14_s11 }
   0x3   :  { %s16_s13 = sshll.u32 %s1193_s12, 4  ;;  %s27_s16 = sshll.u32 %s1231_s1, 4  ;;  %s17_s13 = int_to_ptr.vmem [resolvable:$true] %s16_s13  ;;  %s28_s16 = int_to_ptr.hbm [resolvable:$true] %s27_s16 }
   0x4   :  { %s1194_s17 = smov 64   ;;  %s1195_s18 = smov 4  }
   0x5   :  { %22 = dma.hbm_to_vmem [thread:$0]  %s15_s11, 2048, %s17_s13, [#allocation3], %s1194_s17, %s1194_s17, %s1195_s18  }
   0x6   :  { %s1196_s19 = smov [#allocation5]   ;;  %s1197_s21 = smov 256  }
   0x7   :  { %s29_s20 = sshll.u32 %s1196_s19, 4  ;;  %s1198_s22 = smov 16   ;;  %s30_s20 = int_to_ptr.vmem [resolvable:$true] %s29_s20 }
   0x8   :  { %35 = dma.hbm_to_vmem [thread:$0]  %s28_s16, 4096, %s30_s20, [#allocation6], %s1197_s21, %s1197_s21, %s1198_s22  }
   0x9   :  { %1187 = dma.done.wait [#allocation3], 2048  }
   0xa   :  { %1188 = vsyncadd [#allocation3], 4294965248 }
   0xb   :  { %1189 = dma.done.wait [#allocation6], 4096  }
   0xc   :  { %1190 = vsyncadd [#allocation6], 4294963200  ;;  %v1046_v0 = vld [vmem:[#allocation5 + $0xe0] sm:$0xf]  ;;  %v1106_v1 = vld [vmem:[#allocation5 + $0xec] sm:$0xf0] }
   0xd   :  { %v1104_v2 = vld [vmem:[#allocation5 + $0xe4] sm:$0xf]  ;;  %v1047_v3 = vor.u32 %v1106_v1, %v1046_v0  ;;  %v1048_v4 = vld [vmem:[#allocation5 + $0xf0] sm:$0xf0]  ;;  %v1054_v5 = vld [vmem:[#allocation5 + $0xe8] sm:$0xf] }
   0xe   :  { %v1107_v6 = vld [vmem:[#allocation5 + $0xf4] sm:$0xf0]  ;;  %v1051_v7 = vor.u32 %v1104_v2, %v1048_v4  ;;  %v1105_v9 = vld [vmem:[#allocation5 + $0xec] sm:$0xf]  ;;  %v1056_v10 = vld [vmem:[#allocation5 + $0xf8] sm:$0xf0] }
   0xf   :  { %v1055_v8 = vor.u32 %v1107_v6, %v1054_v5  ;;  %v1030_v11 = vld [vmem:[#allocation5 + $0xc0] sm:$0xf]  ;;  %364 = vmatpush.bf16.msra.mxu0 %v1047_v3  ;;  %v1059_v12 = vor.u32 %v1105_v9, %v1056_v10  ;;  %v1102_v13 = vld [vmem:[#allocation5 + $0xcc] sm:$0xf0]  ;;  %v1100_v14 = vld [vmem:[#allocation5 + $0xc4] sm:$0xf] }
  0x10   :  { %v1032_v15 = vld [vmem:[#allocation5 + $0xd0] sm:$0xf0]  ;;  %453 = vmatpush.bf16.msra.mxu1 %v1051_v7  ;;  %v1031_v16 = vor.u32 %v1102_v13, %v1030_v11  ;;  %v1038_v18 = vld [vmem:[#allocation5 + $0xc8] sm:$0xf]  ;;  %v1103_v19 = vld [vmem:[#allocation5 + $0xd4] sm:$0xf0] }
  0x11   :  { %542 = vmatpush.bf16.msra.mxu2 %v1055_v8  ;;  %v1035_v17 = vor.u32 %v1100_v14, %v1032_v15  ;;  %v1101_v20 = vld [vmem:[#allocation5 + $0xcc] sm:$0xf]  ;;  %631 = vmatpush.bf16.msra.mxu3 %v1059_v12  ;;  %v1039_v21 = vor.u32 %v1103_v19, %v1038_v18  ;;  %v1040_v22 = vld [vmem:[#allocation5 + $0xd8] sm:$0xf0]  ;;  %v1014_v23 = vld [vmem:[#allocation5 + $0xa0] sm:$0xf] }
  0x12   :  { %v1098_v24 = vld [vmem:[#allocation5 + $0xac] sm:$0xf0]  ;;  %v1043_v25 = vor.u32 %v1101_v20, %v1040_v22  ;;  %v1096_v26 = vld [vmem:[#allocation5 + $0xa4] sm:$0xf]  ;;  %v1016_v27 = vld [vmem:[#allocation5 + $0xb0] sm:$0xf0] }
  0x13   :  { %v1022_v28 = vld [vmem:[#allocation5 + $0xa8] sm:$0xf]  ;;  %365 = vmatpush.bf16.msra.mxu0 %v1031_v16  ;;  %v1015_v29 = vor.u32 %v1098_v24, %v1014_v23  ;;  %v1099_v30 = vld [vmem:[#allocation5 + $0xb4] sm:$0xf0]  ;;  %v1097_v31 = vld [vmem:[#allocation5 + $0xac] sm:$0xf]  ;;  %v1019_v33 = vor.u32 %v1096_v26, %v1016_v27 }
  0x14   :  { %v1024_v32 = vld [vmem:[#allocation5 + $0xb8] sm:$0xf0]  ;;  %454 = vmatpush.bf16.msra.mxu1 %v1035_v17  ;;  %v1023_v34 = vor.u32 %v1099_v30, %v1022_v28  ;;  %v998_v35 = vld [vmem:[#allocation5 + $0x80] sm:$0xf]  ;;  %v1094_v36 = vld [vmem:[#allocation5 + $0x8c] sm:$0xf0] }
  0x15   :  { %543 = vmatpush.bf16.msra.mxu2 %v1039_v21  ;;  %v1092_v37 = vld [vmem:[#allocation5 + $0x84] sm:$0xf]  ;;  %632 = vmatpush.bf16.msra.mxu3 %v1043_v25  ;;  %v1027_v38 = vor.u32 %v1097_v31, %v1024_v32  ;;  %v1000_v39 = vld [vmem:[#allocation5 + $0x90] sm:$0xf0]  ;;  %v1006_v40 = vld [vmem:[#allocation5 + $0x88] sm:$0xf]  ;;  %v999_v44 = vor.u32 %v1094_v36, %v998_v35 }
  0x16   :  { %v1095_v41 = vld [vmem:[#allocation5 + $0x94] sm:$0xf0]  ;;  %v1093_v42 = vld [vmem:[#allocation5 + $0x8c] sm:$0xf]  ;;  %v1008_v43 = vld [vmem:[#allocation5 + $0x98] sm:$0xf0]  ;;  %v1003_v45 = vor.u32 %v1092_v37, %v1000_v39 }
  0x17   :  { %366 = vmatpush.bf16.msra.mxu0 %v1015_v29  ;;  %v1007_v46 = vor.u32 %v1095_v41, %v1006_v40  ;;  %v982_v47 = vld [vmem:[#allocation5 + $0x60] sm:$0xf]  ;;  %v1090_v48 = vld [vmem:[#allocation5 + $0x6c] sm:$0xf0]  ;;  %v1088_v49 = vld [vmem:[#allocation5 + $0x64] sm:$0xf]  ;;  %v1011_v50 = vor.u32 %v1093_v42, %v1008_v43 }
  0x18   :  { %455 = vmatpush.bf16.msra.mxu1 %v1019_v33  ;;  %v984_v51 = vld [vmem:[#allocation5 + $0x70] sm:$0xf0]  ;;  %v990_v52 = vld [vmem:[#allocation5 + $0x68] sm:$0xf]  ;;  %v1091_v53 = vld [vmem:[#allocation5 + $0x74] sm:$0xf0]  ;;  %v983_v56 = vor.u32 %v1090_v48, %v982_v47 }
  0x19   :  { %544 = vmatpush.bf16.msra.mxu2 %v1023_v34  ;;  %633 = vmatpush.bf16.msra.mxu3 %v1027_v38  ;;  %v1089_v54 = vld [vmem:[#allocation5 + $0x6c] sm:$0xf]  ;;  %v992_v55 = vld [vmem:[#allocation5 + $0x78] sm:$0xf0]  ;;  %v987_v57 = vor.u32 %v1088_v49, %v984_v51  ;;  %v991_v58 = vor.u32 %v1091_v53, %v990_v52  ;;  %v966_v59 = vld [vmem:[#allocation5 + $0x40] sm:$0xf] }
  0x1a   :  { %v1086_v60 = vld [vmem:[#allocation5 + $0x4c] sm:$0xf0]  ;;  %v1084_v61 = vld [vmem:[#allocation5 + $0x44] sm:$0xf]  ;;  %v995_v62 = vor.u32 %v1089_v54, %v992_v55  ;;  %v968_v63 = vld [vmem:[#allocation5 + $0x50] sm:$0xf0] }
  0x1b   :  { %367 = vmatpush.bf16.msra.mxu0 %v999_v44  ;;  %v974_v0 = vld [vmem:[#allocation5 + $0x48] sm:$0xf]  ;;  %v1087_v1 = vld [vmem:[#allocation5 + $0x54] sm:$0xf0]  ;;  %v1085_v2 = vld [vmem:[#allocation5 + $0x4c] sm:$0xf]  ;;  %v967_v4 = vor.u32 %v1086_v60, %v966_v59  ;;  %v971_v5 = vor.u32 %v1084_v61, %v968_v63 }
  0x1c   :  { %456 = vmatpush.bf16.msra.mxu1 %v1003_v45  ;;  %v976_v3 = vld [vmem:[#allocation5 + $0x58] sm:$0xf0]  ;;  %v975_v6 = vor.u32 %v1087_v1, %v974_v0  ;;  %v950_v7 = vld [vmem:[#allocation5 + $0x20] sm:$0xf]  ;;  %v1082_v8 = vld [vmem:[#allocation5 + $0x2c] sm:$0xf0] }
  0x1d   :  { %545 = vmatpush.bf16.msra.mxu2 %v1007_v46  ;;  %634 = vmatpush.bf16.msra.mxu3 %v1011_v50  ;;  %v1080_v9 = vld [vmem:[#allocation5 + $0x24] sm:$0xf]  ;;  %v979_v10 = vor.u32 %v1085_v2, %v976_v3  ;;  %v952_v11 = vld [vmem:[#allocation5 + $0x30] sm:$0xf0]  ;;  %v958_v12 = vld [vmem:[#allocation5 + $0x28] sm:$0xf]  ;;  %v951_v16 = vor.u32 %v1082_v8, %v950_v7 }
  0x1e   :  { %v1083_v13 = vld [vmem:[#allocation5 + $0x34] sm:$0xf0]  ;;  %v1081_v14 = vld [vmem:[#allocation5 + $0x2c] sm:$0xf]  ;;  %v960_v15 = vld [vmem:[#allocation5 + $0x38] sm:$0xf0]  ;;  %v955_v17 = vor.u32 %v1080_v9, %v952_v11 }
  0x1f   :  { %368 = vmatpush.bf16.msra.mxu0 %v983_v56  ;;  %v959_v18 = vor.u32 %v1083_v13, %v958_v12  ;;  %v934_v19 = vld [vmem:[#allocation5] sm:$0xf]  ;;  %v1078_v20 = vld [vmem:[#allocation5 + $0xc] sm:$0xf0]  ;;  %v1076_v21 = vld [vmem:[#allocation5 + $0x4] sm:$0xf]  ;;  %v963_v22 = vor.u32 %v1081_v14, %v960_v15 }
  0x20   :  { %457 = vmatpush.bf16.msra.mxu1 %v987_v57  ;;  %v936_v23 = vld [vmem:[#allocation5 + $0x10] sm:$0xf0]  ;;  %v942_v24 = vld [vmem:[#allocation5 + $0x8] sm:$0xf]  ;;  %v1079_v25 = vld [vmem:[#allocation5 + $0x14] sm:$0xf0]  ;;  %v935_v28 = vor.u32 %v1078_v20, %v934_v19 }
  0x21   :  { %546 = vmatpush.bf16.msra.mxu2 %v991_v58  ;;  %635 = vmatpush.bf16.msra.mxu3 %v995_v62  ;;  %v1077_v26 = vld [vmem:[#allocation5 + $0xc] sm:$0xf]  ;;  %v944_v27 = vld [vmem:[#allocation5 + $0x18] sm:$0xf0]  ;;  %v939_v29 = vor.u32 %v1076_v21, %v936_v23  ;;  %v943_v30 = vor.u32 %v1079_v25, %v942_v24  ;;  %v1060_v32 = vld [vmem:[#allocation2] sm:$0xff]  ;;  %s1199_s0 = smov [#allocation7]  }
  0x22   :  { %v947_v31 = vor.u32 %v1077_v26, %v944_v27  ;;  %v1061_v33 = vld [vmem:[#allocation2 + $0x8] sm:$0xff]  ;;  %v1062_v34 = vld [vmem:[#allocation2 + $0x10] sm:$0xff]  ;;  %v1063_v35 = vld [vmem:[#allocation2 + $0x18] sm:$0xff]  ;;  %s852_s1 = sshll.u32 %s1199_s0, 4  ;;  %s854_s25 = sshll.u32 %s1232_s2, 4  ;;  %s853_s1 = int_to_ptr.vmem [resolvable:$true] %s852_s1  ;;  %s855_s25 = int_to_ptr.hbm [resolvable:$true] %s854_s25 }
  0x23   :  { %369 = vmatpush.bf16.msra.mxu0 %v967_v4  ;;  %v1064_v36 = vld [vmem:[#allocation2 + $0x20] sm:$0xff]  ;;  %v1065_v37 = vld [vmem:[#allocation2 + $0x28] sm:$0xff]  ;;  %v1066_v38 = vld [vmem:[#allocation2 + $0x30] sm:$0xff] }
  0x24   :  { %458 = vmatpush.bf16.msra.mxu1 %v971_v5  ;;  %v1067_v39 = vld [vmem:[#allocation2 + $0x38] sm:$0xff]  ;;  %v1068_v40 = vld [vmem:[#allocation2 + $0x40] sm:$0xff]  ;;  %v1069_v51 = vld [vmem:[#allocation2 + $0x48] sm:$0xff] }
  0x25   :  { %547 = vmatpush.bf16.msra.mxu2 %v975_v6  ;;  %636 = vmatpush.bf16.msra.mxu3 %v979_v10  ;;  %v1070_v0 = vld [vmem:[#allocation2 + $0x50] sm:$0xff]  ;;  %v1071_v13 = vld [vmem:[#allocation2 + $0x58] sm:$0xff]  ;;  %v1072_v26 = vld [vmem:[#allocation2 + $0x60] sm:$0xff] }
  0x27   :  { %370 = vmatpush.bf16.msra.mxu0 %v951_v16 }
  0x28   :  { %459 = vmatpush.bf16.msra.mxu1 %v955_v17 }
  0x29   :  { %548 = vmatpush.bf16.msra.mxu2 %v959_v18  ;;  %637 = vmatpush.bf16.msra.mxu3 %v963_v22 }
  0x2b   :  { %371 = vmatpush.bf16.msra.mxu0 %v935_v28 }
  0x2c   :  { %460 = vmatpush.bf16.msra.mxu1 %v939_v29 }
  0x2d   :  { %549 = vmatpush.bf16.msra.mxu2 %v943_v30  ;;  %638 = vmatpush.bf16.msra.mxu3 %v947_v31 }
  0x2e   :  { %372 = vmatmul.bf16.vlgmr.msra.gmra.mxu0 %v1060_v32 }
  0x2f   :  { %461 = vmatmul.bf16.vlgmr.msra.gmra.mxu1 %v1060_v32 }
  0x30   :  { %550 = vmatmul.bf16.vlgmr.msra.gmra.mxu2 %v1060_v32  ;;  %639 = vmatmul.bf16.vlgmr.msra.gmra.mxu3 %v1060_v32 }
  0x3e   :  { %377 = vmatmul.bf16.gmra.mxu0 %v1061_v33 }
  0x3f   :  { %466 = vmatmul.bf16.gmra.mxu1 %v1061_v33 }
  0x40   :  { %555 = vmatmul.bf16.gmra.mxu2 %v1061_v33  ;;  %644 = vmatmul.bf16.gmra.mxu3 %v1061_v33 }
  0x4e   :  { %382 = vmatmul.bf16.gmra.mxu0 %v1062_v34 }
  0x4f   :  { %471 = vmatmul.bf16.gmra.mxu1 %v1062_v34 }
  0x50   :  { %560 = vmatmul.bf16.gmra.mxu2 %v1062_v34  ;;  %649 = vmatmul.bf16.gmra.mxu3 %v1062_v34 }
  0x5e   :  { %387 = vmatmul.bf16.gmra.mxu0 %v1063_v35 }
  0x5f   :  { %476 = vmatmul.bf16.gmra.mxu1 %v1063_v35 }
  0x60   :  { %565 = vmatmul.bf16.gmra.mxu2 %v1063_v35  ;;  %654 = vmatmul.bf16.gmra.mxu3 %v1063_v35 }
  0x6e   :  { %392 = vmatmul.bf16.gmra.mxu0 %v1064_v36 }
  0x6f   :  { %481 = vmatmul.bf16.gmra.mxu1 %v1064_v36 }
  0x70   :  { %570 = vmatmul.bf16.gmra.mxu2 %v1064_v36  ;;  %659 = vmatmul.bf16.gmra.mxu3 %v1064_v36 }
  0x7e   :  { %397 = vmatmul.bf16.gmra.mxu0 %v1065_v37 }
  0x7f   :  { %486 = vmatmul.bf16.gmra.mxu1 %v1065_v37 }
  0x80   :  { %575 = vmatmul.bf16.gmra.mxu2 %v1065_v37  ;;  %664 = vmatmul.bf16.gmra.mxu3 %v1065_v37 }
  0x8e   :  { %402 = vmatmul.bf16.gmra.mxu0 %v1066_v38 }
  0x8f   :  { %491 = vmatmul.bf16.gmra.mxu1 %v1066_v38 }
  0x90   :  { %580 = vmatmul.bf16.gmra.mxu2 %v1066_v38  ;;  %669 = vmatmul.bf16.gmra.mxu3 %v1066_v38 }
  0x9e   :  { %407 = vmatmul.bf16.gmra.mxu0 %v1067_v39 }
  0x9f   :  { %496 = vmatmul.bf16.gmra.mxu1 %v1067_v39 }
  0xa0   :  { %585 = vmatmul.bf16.gmra.mxu2 %v1067_v39  ;;  %674 = vmatmul.bf16.gmra.mxu3 %v1067_v39  ;;  %v1073_v39 = vld [vmem:[#allocation2 + $0x68] sm:$0xff] }
  0xab   :  { %v373_v41 = vpop.f32.mrf.mxu0 }
  0xac   :  { %v462_v42 = vpop.f32.mrf.mxu1 }
  0xad   :  { %v720_v43 = vpack.c.bf16 %v462_v42, %v373_v41 }
  0xae   :  { %412 = vmatmul.bf16.gmra.mxu0 %v1068_v40 }
  0xaf   :  { %784 = vst [vmem:[#allocation7] sm:$0xff] %v720_v43  ;;  %501 = vmatmul.bf16.gmra.mxu1 %v1068_v40 }
  0xb0   :  { %590 = vmatmul.bf16.gmra.mxu2 %v1068_v40  ;;  %679 = vmatmul.bf16.gmra.mxu3 %v1068_v40 }
  0xb3   :  { %v551_v44 = vpop.f32.mrf.mxu2  ;;  %v640_v45 = vpop.f32.mrf.mxu3 }
  0xb4   :  { %v375_v46 = vpop.f32.mrf.mxu0  ;;  %v721_v47 = vpack.c.bf16 %v640_v45, %v551_v44  ;;  %v464_v48 = vpop.f32.mrf.mxu1 }
  0xb5   :  { %v722_v49 = vpack.c.bf16 %v464_v48, %v375_v46 }
  0xb6   :  { %785 = vst [vmem:[#allocation7 + $0x8] sm:$0xff] %v721_v47 }
  0xb7   :  { %786 = vst [vmem:[#allocation7 + $0x10] sm:$0xff] %v722_v49 }
  0xbb   :  { %v553_v50 = vpop.f32.mrf.mxu2  ;;  %v642_v52 = vpop.f32.mrf.mxu3 }
  0xbc   :  { %v378_v53 = vpop.f32.mrf.mxu0  ;;  %v723_v54 = vpack.c.bf16 %v642_v52, %v553_v50  ;;  %v467_v55 = vpop.f32.mrf.mxu1  ;;  %v1074_v52 = vld [vmem:[#allocation2 + $0x70] sm:$0xff] }
  0xbd   :  { %v724_v56 = vpack.c.bf16 %v467_v55, %v378_v53 }
  0xbe   :  { %787 = vst [vmem:[#allocation7 + $0x18] sm:$0xff] %v723_v54  ;;  %417 = vmatmul.bf16.gmra.mxu0 %v1069_v51 }
  0xbf   :  { %788 = vst [vmem:[#allocation7 + $0x20] sm:$0xff] %v724_v56  ;;  %506 = vmatmul.bf16.gmra.mxu1 %v1069_v51 }
  0xc0   :  { %595 = vmatmul.bf16.gmra.mxu2 %v1069_v51  ;;  %684 = vmatmul.bf16.gmra.mxu3 %v1069_v51 }
  0xc3   :  { %v556_v57 = vpop.f32.mrf.mxu2  ;;  %v645_v58 = vpop.f32.mrf.mxu3 }
  0xc4   :  { %v380_v59 = vpop.f32.mrf.mxu0  ;;  %v725_v60 = vpack.c.bf16 %v645_v58, %v556_v57  ;;  %v469_v61 = vpop.f32.mrf.mxu1 }
  0xc5   :  { %v726_v62 = vpack.c.bf16 %v469_v61, %v380_v59 }
  0xc6   :  { %789 = vst [vmem:[#allocation7 + $0x28] sm:$0xff] %v725_v60 }
  0xc7   :  { %790 = vst [vmem:[#allocation7 + $0x30] sm:$0xff] %v726_v62 }
  0xcb   :  { %v558_v63 = vpop.f32.mrf.mxu2  ;;  %v647_v1 = vpop.f32.mrf.mxu3 }
  0xcc   :  { %v383_v2 = vpop.f32.mrf.mxu0  ;;  %v727_v3 = vpack.c.bf16 %v647_v1, %v558_v63  ;;  %v472_v4 = vpop.f32.mrf.mxu1  ;;  %v1075_v1 = vld [vmem:[#allocation2 + $0x78] sm:$0xff] }
  0xcd   :  { %v728_v5 = vpack.c.bf16 %v472_v4, %v383_v2 }
  0xce   :  { %791 = vst [vmem:[#allocation7 + $0x38] sm:$0xff] %v727_v3  ;;  %422 = vmatmul.bf16.gmra.mxu0 %v1070_v0 }
  0xcf   :  { %792 = vst [vmem:[#allocation7 + $0x40] sm:$0xff] %v728_v5  ;;  %511 = vmatmul.bf16.gmra.mxu1 %v1070_v0 }
  0xd0   :  { %600 = vmatmul.bf16.gmra.mxu2 %v1070_v0  ;;  %689 = vmatmul.bf16.gmra.mxu3 %v1070_v0 }
  0xd3   :  { %v561_v6 = vpop.f32.mrf.mxu2  ;;  %v650_v7 = vpop.f32.mrf.mxu3 }
  0xd4   :  { %v385_v8 = vpop.f32.mrf.mxu0  ;;  %v729_v9 = vpack.c.bf16 %v650_v7, %v561_v6  ;;  %v474_v10 = vpop.f32.mrf.mxu1 }
  0xd5   :  { %v730_v11 = vpack.c.bf16 %v474_v10, %v385_v8 }
  0xd6   :  { %793 = vst [vmem:[#allocation7 + $0x48] sm:$0xff] %v729_v9 }
  0xd7   :  { %794 = vst [vmem:[#allocation7 + $0x50] sm:$0xff] %v730_v11 }
  0xdb   :  { %v563_v12 = vpop.f32.mrf.mxu2  ;;  %v652_v14 = vpop.f32.mrf.mxu3 }
  0xdc   :  { %v388_v15 = vpop.f32.mrf.mxu0  ;;  %v731_v16 = vpack.c.bf16 %v652_v14, %v563_v12  ;;  %v477_v17 = vpop.f32.mrf.mxu1 }
  0xdd   :  { %v732_v18 = vpack.c.bf16 %v477_v17, %v388_v15 }
  0xde   :  { %795 = vst [vmem:[#allocation7 + $0x58] sm:$0xff] %v731_v16  ;;  %427 = vmatmul.bf16.gmra.mxu0 %v1071_v13 }
  0xdf   :  { %796 = vst [vmem:[#allocation7 + $0x60] sm:$0xff] %v732_v18  ;;  %516 = vmatmul.bf16.gmra.mxu1 %v1071_v13 }
  0xe0   :  { %605 = vmatmul.bf16.gmra.mxu2 %v1071_v13  ;;  %694 = vmatmul.bf16.gmra.mxu3 %v1071_v13 }
  0xe3   :  { %v566_v19 = vpop.f32.mrf.mxu2  ;;  %v655_v20 = vpop.f32.mrf.mxu3 }
  0xe4   :  { %v390_v21 = vpop.f32.mrf.mxu0  ;;  %v733_v22 = vpack.c.bf16 %v655_v20, %v566_v19  ;;  %v479_v23 = vpop.f32.mrf.mxu1 }
  0xe5   :  { %v734_v24 = vpack.c.bf16 %v479_v23, %v390_v21 }
  0xe6   :  { %797 = vst [vmem:[#allocation7 + $0x68] sm:$0xff] %v733_v22 }
  0xe7   :  { %798 = vst [vmem:[#allocation7 + $0x70] sm:$0xff] %v734_v24 }
  0xeb   :  { %v568_v25 = vpop.f32.mrf.mxu2  ;;  %v657_v27 = vpop.f32.mrf.mxu3 }
  0xec   :  { %v393_v28 = vpop.f32.mrf.mxu0  ;;  %v735_v29 = vpack.c.bf16 %v657_v27, %v568_v25  ;;  %v482_v30 = vpop.f32.mrf.mxu1 }
  0xed   :  { %v736_v31 = vpack.c.bf16 %v482_v30, %v393_v28 }
  0xee   :  { %799 = vst [vmem:[#allocation7 + $0x78] sm:$0xff] %v735_v29  ;;  %432 = vmatmul.bf16.gmra.mxu0 %v1072_v26 }
  0xef   :  { %800 = vst [vmem:[#allocation7 + $0x80] sm:$0xff] %v736_v31  ;;  %521 = vmatmul.bf16.gmra.mxu1 %v1072_v26 }
  0xf0   :  { %610 = vmatmul.bf16.gmra.mxu2 %v1072_v26  ;;  %699 = vmatmul.bf16.gmra.mxu3 %v1072_v26 }
  0xf3   :  { %v571_v32 = vpop.f32.mrf.mxu2  ;;  %v660_v33 = vpop.f32.mrf.mxu3 }
  0xf4   :  { %v395_v34 = vpop.f32.mrf.mxu0  ;;  %v737_v35 = vpack.c.bf16 %v660_v33, %v571_v32  ;;  %v484_v36 = vpop.f32.mrf.mxu1 }
  0xf5   :  { %v738_v37 = vpack.c.bf16 %v484_v36, %v395_v34 }
  0xf6   :  { %801 = vst [vmem:[#allocation7 + $0x88] sm:$0xff] %v737_v35 }
  0xf7   :  { %802 = vst [vmem:[#allocation7 + $0x90] sm:$0xff] %v738_v37 }
  0xfb   :  { %v573_v38 = vpop.f32.mrf.mxu2  ;;  %v662_v40 = vpop.f32.mrf.mxu3 }
  0xfc   :  { %v398_v41 = vpop.f32.mrf.mxu0  ;;  %v739_v42 = vpack.c.bf16 %v662_v40, %v573_v38  ;;  %v487_v43 = vpop.f32.mrf.mxu1 }
  0xfd   :  { %v740_v44 = vpack.c.bf16 %v487_v43, %v398_v41 }
  0xfe   :  { %803 = vst [vmem:[#allocation7 + $0x98] sm:$0xff] %v739_v42  ;;  %437 = vmatmul.bf16.gmra.mxu0 %v1073_v39 }
  0xff   :  { %804 = vst [vmem:[#allocation7 + $0xa0] sm:$0xff] %v740_v44  ;;  %526 = vmatmul.bf16.gmra.mxu1 %v1073_v39 }
 0x100   :  { %615 = vmatmul.bf16.gmra.mxu2 %v1073_v39  ;;  %704 = vmatmul.bf16.gmra.mxu3 %v1073_v39 }
 0x103   :  { %v576_v45 = vpop.f32.mrf.mxu2  ;;  %v665_v46 = vpop.f32.mrf.mxu3 }
 0x104   :  { %v400_v47 = vpop.f32.mrf.mxu0  ;;  %v741_v48 = vpack.c.bf16 %v665_v46, %v576_v45  ;;  %v489_v49 = vpop.f32.mrf.mxu1 }
 0x105   :  { %v742_v50 = vpack.c.bf16 %v489_v49, %v400_v47 }
 0x106   :  { %805 = vst [vmem:[#allocation7 + $0xa8] sm:$0xff] %v741_v48 }
 0x107   :  { %806 = vst [vmem:[#allocation7 + $0xb0] sm:$0xff] %v742_v50 }
 0x10b   :  { %v578_v51 = vpop.f32.mrf.mxu2  ;;  %v667_v53 = vpop.f32.mrf.mxu3 }
 0x10c   :  { %v403_v54 = vpop.f32.mrf.mxu0  ;;  %v743_v55 = vpack.c.bf16 %v667_v53, %v578_v51  ;;  %v492_v56 = vpop.f32.mrf.mxu1 }
 0x10d   :  { %v744_v57 = vpack.c.bf16 %v492_v56, %v403_v54 }
 0x10e   :  { %807 = vst [vmem:[#allocation7 + $0xb8] sm:$0xff] %v743_v55  ;;  %442 = vmatmul.bf16.gmra.mxu0 %v1074_v52 }
 0x10f   :  { %808 = vst [vmem:[#allocation7 + $0xc0] sm:$0xff] %v744_v57  ;;  %531 = vmatmul.bf16.gmra.mxu1 %v1074_v52 }
 0x110   :  { %620 = vmatmul.bf16.gmra.mxu2 %v1074_v52  ;;  %709 = vmatmul.bf16.gmra.mxu3 %v1074_v52 }
 0x113   :  { %v581_v58 = vpop.f32.mrf.mxu2  ;;  %v670_v59 = vpop.f32.mrf.mxu3 }
 0x114   :  { %v405_v60 = vpop.f32.mrf.mxu0  ;;  %v745_v61 = vpack.c.bf16 %v670_v59, %v581_v58  ;;  %v494_v62 = vpop.f32.mrf.mxu1 }
 0x115   :  { %v746_v63 = vpack.c.bf16 %v494_v62, %v405_v60 }
 0x116   :  { %809 = vst [vmem:[#allocation7 + $0xc8] sm:$0xff] %v745_v61 }
 0x117   :  { %810 = vst [vmem:[#allocation7 + $0xd0] sm:$0xff] %v746_v63 }
 0x11b   :  { %v583_v0 = vpop.f32.mrf.mxu2  ;;  %v672_v2 = vpop.f32.mrf.mxu3 }
 0x11c   :  { %v408_v3 = vpop.f32.mrf.mxu0  ;;  %v747_v4 = vpack.c.bf16 %v672_v2, %v583_v0  ;;  %v497_v5 = vpop.f32.mrf.mxu1 }
 0x11d   :  { %v748_v6 = vpack.c.bf16 %v497_v5, %v408_v3 }
 0x11e   :  { %811 = vst [vmem:[#allocation7 + $0xd8] sm:$0xff] %v747_v4  ;;  %447 = vmatmul.bf16.gmra.mxu0 %v1075_v1 }
 0x11f   :  { %812 = vst [vmem:[#allocation7 + $0xe0] sm:$0xff] %v748_v6  ;;  %536 = vmatmul.bf16.gmra.mxu1 %v1075_v1 }
 0x120   :  { %625 = vmatmul.bf16.gmra.mxu2 %v1075_v1  ;;  %714 = vmatmul.bf16.gmra.mxu3 %v1075_v1 }
 0x123   :  { %v586_v7 = vpop.f32.mrf.mxu2  ;;  %v675_v8 = vpop.f32.mrf.mxu3 }
 0x124   :  { %v410_v9 = vpop.f32.mrf.mxu0  ;;  %v749_v10 = vpack.c.bf16 %v675_v8, %v586_v7  ;;  %v499_v11 = vpop.f32.mrf.mxu1 }
 0x125   :  { %v750_v12 = vpack.c.bf16 %v499_v11, %v410_v9 }
 0x126   :  { %813 = vst [vmem:[#allocation7 + $0xe8] sm:$0xff] %v749_v10 }
 0x127   :  { %814 = vst [vmem:[#allocation7 + $0xf0] sm:$0xff] %v750_v12 }
 0x12b   :  { %v588_v13 = vpop.f32.mrf.mxu2  ;;  %v677_v14 = vpop.f32.mrf.mxu3 }
 0x12c   :  { %v413_v15 = vpop.f32.mrf.mxu0  ;;  %v751_v16 = vpack.c.bf16 %v677_v14, %v588_v13  ;;  %v502_v17 = vpop.f32.mrf.mxu1 }
 0x12d   :  { %v752_v18 = vpack.c.bf16 %v502_v17, %v413_v15 }
 0x12e   :  { %815 = vst [vmem:[#allocation7 + $0xf8] sm:$0xff] %v751_v16 }
 0x12f   :  { %816 = vst [vmem:[#allocation7 + $0x100] sm:$0xff] %v752_v18 }
 0x133   :  { %v591_v19 = vpop.f32.mrf.mxu2  ;;  %v680_v20 = vpop.f32.mrf.mxu3 }
 0x134   :  { %v415_v21 = vpop.f32.mrf.mxu0  ;;  %v753_v22 = vpack.c.bf16 %v680_v20, %v591_v19  ;;  %v504_v23 = vpop.f32.mrf.mxu1 }
 0x135   :  { %v754_v24 = vpack.c.bf16 %v504_v23, %v415_v21 }
 0x136   :  { %817 = vst [vmem:[#allocation7 + $0x108] sm:$0xff] %v753_v22 }
 0x137   :  { %818 = vst [vmem:[#allocation7 + $0x110] sm:$0xff] %v754_v24 }
 0x13b   :  { %v593_v25 = vpop.f32.mrf.mxu2  ;;  %v682_v26 = vpop.f32.mrf.mxu3 }
 0x13c   :  { %v418_v27 = vpop.f32.mrf.mxu0  ;;  %v755_v28 = vpack.c.bf16 %v682_v26, %v593_v25  ;;  %v507_v29 = vpop.f32.mrf.mxu1 }
 0x13d   :  { %v756_v30 = vpack.c.bf16 %v507_v29, %v418_v27 }
 0x13e   :  { %819 = vst [vmem:[#allocation7 + $0x118] sm:$0xff] %v755_v28 }
 0x13f   :  { %820 = vst [vmem:[#allocation7 + $0x120] sm:$0xff] %v756_v30 }
 0x143   :  { %v596_v31 = vpop.f32.mrf.mxu2  ;;  %v685_v32 = vpop.f32.mrf.mxu3 }
 0x144   :  { %v420_v33 = vpop.f32.mrf.mxu0  ;;  %v757_v34 = vpack.c.bf16 %v685_v32, %v596_v31  ;;  %v509_v35 = vpop.f32.mrf.mxu1 }
 0x145   :  { %v758_v36 = vpack.c.bf16 %v509_v35, %v420_v33 }
 0x146   :  { %821 = vst [vmem:[#allocation7 + $0x128] sm:$0xff] %v757_v34 }
 0x147   :  { %822 = vst [vmem:[#allocation7 + $0x130] sm:$0xff] %v758_v36 }
 0x14b   :  { %v598_v37 = vpop.f32.mrf.mxu2  ;;  %v687_v38 = vpop.f32.mrf.mxu3 }
 0x14c   :  { %v423_v39 = vpop.f32.mrf.mxu0  ;;  %v759_v40 = vpack.c.bf16 %v687_v38, %v598_v37  ;;  %v512_v41 = vpop.f32.mrf.mxu1 }
 0x14d   :  { %v760_v42 = vpack.c.bf16 %v512_v41, %v423_v39 }
 0x14e   :  { %823 = vst [vmem:[#allocation7 + $0x138] sm:$0xff] %v759_v40 }
 0x14f   :  { %824 = vst [vmem:[#allocation7 + $0x140] sm:$0xff] %v760_v42 }
 0x153   :  { %v601_v43 = vpop.f32.mrf.mxu2  ;;  %v690_v44 = vpop.f32.mrf.mxu3 }
 0x154   :  { %v425_v45 = vpop.f32.mrf.mxu0  ;;  %v761_v46 = vpack.c.bf16 %v690_v44, %v601_v43  ;;  %v514_v47 = vpop.f32.mrf.mxu1 }
 0x155   :  { %v762_v48 = vpack.c.bf16 %v514_v47, %v425_v45 }
 0x156   :  { %825 = vst [vmem:[#allocation7 + $0x148] sm:$0xff] %v761_v46 }
 0x157   :  { %826 = vst [vmem:[#allocation7 + $0x150] sm:$0xff] %v762_v48 }
 0x15b   :  { %v603_v49 = vpop.f32.mrf.mxu2  ;;  %v692_v50 = vpop.f32.mrf.mxu3 }
 0x15c   :  { %v428_v51 = vpop.f32.mrf.mxu0  ;;  %v763_v52 = vpack.c.bf16 %v692_v50, %v603_v49  ;;  %v517_v53 = vpop.f32.mrf.mxu1 }
 0x15d   :  { %v764_v54 = vpack.c.bf16 %v517_v53, %v428_v51 }
 0x15e   :  { %827 = vst [vmem:[#allocation7 + $0x158] sm:$0xff] %v763_v52 }
 0x15f   :  { %828 = vst [vmem:[#allocation7 + $0x160] sm:$0xff] %v764_v54 }
 0x163   :  { %v606_v55 = vpop.f32.mrf.mxu2  ;;  %v695_v56 = vpop.f32.mrf.mxu3 }
 0x164   :  { %v430_v57 = vpop.f32.mrf.mxu0  ;;  %v765_v58 = vpack.c.bf16 %v695_v56, %v606_v55  ;;  %v519_v59 = vpop.f32.mrf.mxu1 }
 0x165   :  { %v766_v60 = vpack.c.bf16 %v519_v59, %v430_v57 }
 0x166   :  { %829 = vst [vmem:[#allocation7 + $0x168] sm:$0xff] %v765_v58 }
 0x167   :  { %830 = vst [vmem:[#allocation7 + $0x170] sm:$0xff] %v766_v60 }
 0x16b   :  { %v608_v61 = vpop.f32.mrf.mxu2  ;;  %v697_v62 = vpop.f32.mrf.mxu3 }
 0x16c   :  { %v433_v63 = vpop.f32.mrf.mxu0  ;;  %v767_v0 = vpack.c.bf16 %v697_v62, %v608_v61  ;;  %v522_v1 = vpop.f32.mrf.mxu1 }
 0x16d   :  { %v768_v2 = vpack.c.bf16 %v522_v1, %v433_v63 }
 0x16e   :  { %831 = vst [vmem:[#allocation7 + $0x178] sm:$0xff] %v767_v0 }
 0x16f   :  { %832 = vst [vmem:[#allocation7 + $0x180] sm:$0xff] %v768_v2 }
 0x173   :  { %v611_v3 = vpop.f32.mrf.mxu2  ;;  %v700_v4 = vpop.f32.mrf.mxu3 }
 0x174   :  { %v435_v5 = vpop.f32.mrf.mxu0  ;;  %v769_v6 = vpack.c.bf16 %v700_v4, %v611_v3  ;;  %v524_v7 = vpop.f32.mrf.mxu1 }
 0x175   :  { %v770_v8 = vpack.c.bf16 %v524_v7, %v435_v5 }
 0x176   :  { %833 = vst [vmem:[#allocation7 + $0x188] sm:$0xff] %v769_v6 }
 0x177   :  { %834 = vst [vmem:[#allocation7 + $0x190] sm:$0xff] %v770_v8 }
 0x17b   :  { %v613_v9 = vpop.f32.mrf.mxu2  ;;  %v702_v10 = vpop.f32.mrf.mxu3 }
 0x17c   :  { %v438_v11 = vpop.f32.mrf.mxu0  ;;  %v771_v12 = vpack.c.bf16 %v702_v10, %v613_v9  ;;  %v527_v13 = vpop.f32.mrf.mxu1 }
 0x17d   :  { %v772_v14 = vpack.c.bf16 %v527_v13, %v438_v11 }
 0x17e   :  { %835 = vst [vmem:[#allocation7 + $0x198] sm:$0xff] %v771_v12 }
 0x17f   :  { %836 = vst [vmem:[#allocation7 + $0x1a0] sm:$0xff] %v772_v14 }
 0x183   :  { %v616_v15 = vpop.f32.mrf.mxu2  ;;  %v705_v16 = vpop.f32.mrf.mxu3 }
 0x184   :  { %v440_v17 = vpop.f32.mrf.mxu0  ;;  %v773_v18 = vpack.c.bf16 %v705_v16, %v616_v15  ;;  %v529_v19 = vpop.f32.mrf.mxu1 }
 0x185   :  { %v774_v20 = vpack.c.bf16 %v529_v19, %v440_v17 }
 0x186   :  { %837 = vst [vmem:[#allocation7 + $0x1a8] sm:$0xff] %v773_v18 }
 0x187   :  { %838 = vst [vmem:[#allocation7 + $0x1b0] sm:$0xff] %v774_v20 }
 0x18b   :  { %v618_v21 = vpop.f32.mrf.mxu2  ;;  %v707_v22 = vpop.f32.mrf.mxu3 }
 0x18c   :  { %v443_v23 = vpop.f32.mrf.mxu0  ;;  %v775_v24 = vpack.c.bf16 %v707_v22, %v618_v21  ;;  %v532_v25 = vpop.f32.mrf.mxu1 }
 0x18d   :  { %v776_v26 = vpack.c.bf16 %v532_v25, %v443_v23 }
 0x18e   :  { %839 = vst [vmem:[#allocation7 + $0x1b8] sm:$0xff] %v775_v24 }
 0x18f   :  { %840 = vst [vmem:[#allocation7 + $0x1c0] sm:$0xff] %v776_v26 }
 0x193   :  { %v621_v27 = vpop.f32.mrf.mxu2  ;;  %v710_v28 = vpop.f32.mrf.mxu3 }
 0x194   :  { %v445_v29 = vpop.f32.mrf.mxu0  ;;  %v777_v30 = vpack.c.bf16 %v710_v28, %v621_v27  ;;  %v534_v31 = vpop.f32.mrf.mxu1 }
 0x195   :  { %v778_v32 = vpack.c.bf16 %v534_v31, %v445_v29 }
 0x196   :  { %841 = vst [vmem:[#allocation7 + $0x1c8] sm:$0xff] %v777_v30 }
 0x197   :  { %842 = vst [vmem:[#allocation7 + $0x1d0] sm:$0xff] %v778_v32 }
 0x19b   :  { %v623_v33 = vpop.f32.mrf.mxu2  ;;  %v712_v34 = vpop.f32.mrf.mxu3 }
 0x19c   :  { %v448_v35 = vpop.f32.mrf.mxu0  ;;  %v779_v36 = vpack.c.bf16 %v712_v34, %v623_v33  ;;  %v537_v37 = vpop.f32.mrf.mxu1 }
 0x19d   :  { %v780_v38 = vpack.c.bf16 %v537_v37, %v448_v35 }
 0x19e   :  { %843 = vst [vmem:[#allocation7 + $0x1d8] sm:$0xff] %v779_v36 }
 0x19f   :  { %844 = vst [vmem:[#allocation7 + $0x1e0] sm:$0xff] %v780_v38 }
 0x1a3   :  { %v626_v39 = vpop.f32.mrf.mxu2  ;;  %v715_v40 = vpop.f32.mrf.mxu3 }
 0x1a4   :  { %v450_v41 = vpop.f32.mrf.mxu0  ;;  %v781_v42 = vpack.c.bf16 %v715_v40, %v626_v39  ;;  %v539_v43 = vpop.f32.mrf.mxu1 }
 0x1a5   :  { %v782_v44 = vpack.c.bf16 %v539_v43, %v450_v41 }
 0x1a6   :  { %845 = vst [vmem:[#allocation7 + $0x1e8] sm:$0xff] %v781_v42 }
 0x1a7   :  { %846 = vst [vmem:[#allocation7 + $0x1f0] sm:$0xff] %v782_v44 }
 0x1ab   :  { %v628_v45 = vpop.f32.mrf.mxu2  ;;  %v717_v46 = vpop.f32.mrf.mxu3 }
 0x1ac   :  { %v783_v47 = vpack.c.bf16 %v717_v46, %v628_v45 }
 0x1ae   :  { %847 = vst [vmem:[#allocation7 + $0x1f8] sm:$0xff] %v783_v47 }
 0x1af   :  { %860 = dma.vmem_to_hbm [thread:$0]  %s853_s1, 8192, %s855_s25, [#allocation4], %s1197_s21, %s1197_s21, %s1198_s22  }
 0x1b0   :  { %1191 = dma.done.wait [#allocation4], 8192  }
 0x1b1   :  { %1192 = vsyncadd [#allocation4], 4294959104 }
 0x1b2   :  { %865 = vsyncpa [#allocation3], 1 }
 0x1b3   :  { %866 = vsyncpa [#allocation6], 1 }
 0x1b4   :  { %867 = vsyncpa [#allocation4], 1 }

</bundles_post_ra>
